<compile_context>
chip_gen: v6e
topology: v6e:2x2x1
jax: 0.10.0
libtpu: 0.0.40
codegen_flags: <defaults>
</compile_context>

<pallas_src>
import jax
import jax.numpy as jnp
from jax import lax
from jax.experimental import pallas as pl
from jax.experimental.pallas import tpu as pltpu

_VMEM_LIMIT = 48 * 1024 * 1024   # <= v7x physical 64 MiB; well under v5e/v6e.


def _sigmoid(x):
    # 0.5*tanh(0.5x)+0.5 == sigmoid(x): one EUP push instead of exp + divide.
    return 0.5 * jnp.tanh(0.5 * x) + 0.5


def _rev_chunk(d, c, nc):
    # chunk index: c for the forward direction (d==0), nc-1-c for backward.
    return c + d * (nc - 1 - 2 * c)


# ---------------------------------------------------------------------------
# Kernel 1: wide input projection  gx = sum_s x[s] @ W_ih[s] + b  (both dirs)
# ---------------------------------------------------------------------------
def _input_proj_kernel(x_ref, w_ref, b_ref, gx_ref):
    """x_ref: (S, Tc, B, F) stacked input streams (S=1 embeddings, S=2 prev
    bi-layer fwd/bwd halves); w_ref: (S, F, 8H) bf16; b_ref: (1, 8H) f32
    (b_ih + b_hh, both directions); gx_ref: (2, Tc, B, 4H) output."""
    S, Tc, B, F = x_ref.shape
    H4 = gx_ref.shape[-1]
    total = jnp.zeros((Tc * B, 2 * H4), jnp.float32)
    for s in range(S):                      # static, S in {1, 2}
        xs = x_ref[s].reshape(Tc * B, F).astype(jnp.bfloat16)
        total = total + jnp.dot(xs, w_ref[s],
                                preferred_element_type=jnp.float32)
    total = (total + b_ref[...]).reshape(Tc, B, 2 * H4)
    gx_ref[0] = total[:, :, :H4]            # forward-direction gates
    gx_ref[1] = total[:, :, H4:]            # backward-direction gates


def _run_input_proj(x_stacked, w_ih_bf16, bias, tc):
    S, T, B, F = x_stacked.shape
    H8 = w_ih_bf16.shape[-1]
    H4 = H8 // 2
    nc = T // tc
    return pl.pallas_call(
        _input_proj_kernel,
        out_shape=jax.ShapeDtypeStruct((2, T, B, H4), jnp.float32),
        grid=(nc,),
        in_specs=[
            pl.BlockSpec((S, tc, B, F), lambda c: (0, c, 0, 0)),
            pl.BlockSpec((S, F, H8), lambda c: (0, 0, 0)),
            pl.BlockSpec((1, H8), lambda c: (0, 0)),
        ],
        out_specs=pl.BlockSpec((2, tc, B, H4), lambda c: (0, c, 0, 0)),
        compiler_params=pltpu.CompilerParams(
            dimension_semantics=("parallel",),
            vmem_limit_bytes=_VMEM_LIMIT),
    )(x_stacked, w_ih_bf16, bias)


# ---------------------------------------------------------------------------
# Kernel 2: bidirectional recurrence, streamed over T-chunks
# ---------------------------------------------------------------------------
def _bilstm_recurrence_kernel(gx_ref, whh_ref, out_ref, h_scr, c_scr):
    """grid = (direction, chunk).  gx_ref: (Tc, B, 4H) this (dir, chunk)'s
    precomputed gate pre-activations; whh_ref: (H, 4H) bf16; out_ref:
    (Tc, B, H); h_scr/c_scr: persistent (B, H) f32 state across chunks."""
    Tc, B, H4 = gx_ref.shape
    H = H4 // 4
    d = pl.program_id(0)

    @pl.when(pl.program_id(1) == 0)         # start of each direction's sweep
    def _():
        h_scr[...] = jnp.zeros_like(h_scr)
        c_scr[...] = jnp.zeros_like(c_scr)

    whh = whh_ref[...]                       # loop-invariant, hoisted (bf16)

    def cell(t):
        gates = gx_ref[t] + jnp.dot(h_scr[...].astype(jnp.bfloat16), whh,
                                    preferred_element_type=jnp.float32)
        i = _sigmoid(gates[:, 0:H])
        f = _sigmoid(gates[:, H:2 * H])
        g = jnp.tanh(gates[:, 2 * H:3 * H])
        o = _sigmoid(gates[:, 3 * H:4 * H])
        c = f * c_scr[...] + i * g
        h = o * jnp.tanh(c)
        c_scr[...] = c
        h_scr[...] = h
        out_ref[t] = h

    unroll = int(min(8, Tc))                 # partial unroll (review)

    @pl.when(d == 0)
    def _():
        def body(s, carry):
            cell(s)
            return carry
        lax.fori_loop(0, Tc, body, 0, unroll=unroll)

    @pl.when(d != 0)
    def _():
        def body(s, carry):
            cell(Tc - 1 - s)                 # in-chunk time reversal
            return carry
        lax.fori_loop(0, Tc, body, 0, unroll=unroll)


def _run_bilstm_recurrence(gx, w_hh_bf16, tc):
    _, T, B, H4 = gx.shape
    H = H4 // 4
    nc = T // tc
    idx = lambda d, c: (d, _rev_chunk(d, c, nc), 0, 0)
    return pl.pallas_call(
        _bilstm_recurrence_kernel,
        out_shape=jax.ShapeDtypeStruct((2, T, B, H), jnp.float32),
        grid=(2, nc),
        in_specs=[
            pl.BlockSpec((None, tc, B, H4), idx),
            pl.BlockSpec((None, H, H4), lambda d, c: (d, 0, 0)),
        ],
        out_specs=pl.BlockSpec((None, tc, B, H), idx),
        scratch_shapes=[pltpu.VMEM((B, H), jnp.float32),   # h (persistent)
                        pltpu.VMEM((B, H), jnp.float32)],  # c (persistent)
        compiler_params=pltpu.CompilerParams(
            dimension_semantics=("parallel", "arbitrary"),
            vmem_limit_bytes=_VMEM_LIMIT),
    )(gx, w_hh_bf16)


# ---------------------------------------------------------------------------
# Kernel 3: last-valid-timestep DMA gather + fused Sequential head
# ---------------------------------------------------------------------------
def _gather_head_kernel(len_ref, h_hbm, w1_ref, b1_ref, w2_ref, b2_ref,
                        o_ref, feat_scr, sem):
    """len_ref: (B,) int32 in SMEM (scalar-prefetched); h_hbm: (2,T,B,H) in
    HBM; gathers only the B needed (H,) rows per direction via DMA."""
    B = o_ref.shape[0]
    for b in range(B):                       # static trip count
        t = len_ref[b] - 1                   # assumes lengths >= 1
        for d in range(2):
            pltpu.make_async_copy(h_hbm.at[d, t, b], feat_scr.at[d, b],
                                  sem.at[d, b]).start()
    for b in range(B):
        for d in range(2):
            pltpu.make_async_copy(h_hbm.at[0, 0, 0], feat_scr.at[d, b],
                                  sem.at[d, b]).wait()
    w1 = w1_ref[...]                                           # (2, H, H)
    h1 = (jnp.dot(feat_scr[0], w1[0], preferred_element_type=jnp.float32)
          + jnp.dot(feat_scr[1], w1[1], preferred_element_type=jnp.float32)
          + b1_ref[...])
    o_ref[...] = (jnp.dot(h1, w2_ref[...], preferred_element_type=jnp.float32)
                  + b2_ref[...])


def _run_gather_head(h_stacked, lengths, w1, b1, w2, b2):
    _, T, B, H = h_stacked.shape
    grid_spec = pltpu.PrefetchScalarGridSpec(
        num_scalar_prefetch=1,
        grid=(1,),
        in_specs=[
            pl.BlockSpec(memory_space=pl.ANY),                 # stays in HBM
            pl.BlockSpec((2, H, H), lambda i, L: (0, 0, 0)),
            pl.BlockSpec((1, H), lambda i, L: (0, 0)),
            pl.BlockSpec((H, 1), lambda i, L: (0, 0)),
            pl.BlockSpec((1, 1), lambda i, L: (0, 0)),
        ],
        out_specs=pl.BlockSpec((B, 1), lambda i, L: (0, 0)),
        scratch_shapes=[
            pltpu.VMEM((2, B, H), jnp.float32),
            pltpu.SemaphoreType.DMA((2, B)),
        ],
    )
    return pl.pallas_call(
        _gather_head_kernel,
        out_shape=jax.ShapeDtypeStruct((B, 1), jnp.float32),
        grid_spec=grid_spec,
        compiler_params=pltpu.CompilerParams(vmem_limit_bytes=_VMEM_LIMIT),
    )(lengths, h_stacked, w1, b1, w2, b2)


# ---------------------------------------------------------------------------
# Parameters & forward
# ---------------------------------------------------------------------------
def init_params(key, embedding_dim, hidden_dim):
    H, E = hidden_dim, embedding_dim
    bound = 1.0 / float(H) ** 0.5
    keys = iter(jax.random.split(key, 16))

    def u(shape, b=bound):
        return jax.random.uniform(next(keys), shape, jnp.float32, -b, b)

    params = {}
    for layer, (S, F) in ((0, (1, E)), (1, (2, H))):
        # gate axis = [fwd(i,f,g,o) | bwd(i,f,g,o)]; S row-splits match the
        # stacked (S,T,B,F) layer input so no direction-concat is needed.
        params[f"w_ih_l{layer}"] = u((S, F, 8 * H))
        params[f"w_hh_l{layer}"] = u((2, H, 4 * H))
        params[f"b_l{layer}"] = u((1, 8 * H)) + u((1, 8 * H))   # b_ih + b_hh
    hb1 = 1.0 / float(2 * H) ** 0.5
    hb2 = 1.0 / float(H) ** 0.5
    params["w1"] = u((2, H, H), hb1)          # Linear(2H -> H), row-split
    params["b1"] = u((1, H), hb1)
    # TODO(synk): the reference declares nn.Linear(2*hidden_dim, 1) after
    # Linear(2H->H), which is shape-inconsistent; the consistent (H -> 1) is used.
    params["w2"] = u((H, 1), hb2)
    params["b2"] = u((1, 1), hb2)
    return params


def custom_lstm2_forward(params, antigen, antigen_reversed, antigen_full,
                         mask, lengths, hidden_dim, *, time_chunk=4):
    # antigen_reversed / antigen_full / mask are unused by the reference forward.
    del antigen_reversed, antigen_full, mask
    B, T, _ = antigen.shape
    BP = -(-B // 8) * 8                       # pad batch to a sublane multiple
    tc = max(1, min(time_chunk, T))
    while T % tc:                             # chunk must divide T exactly
        tc -= 1

    x = jnp.transpose(antigen.astype(jnp.float32), (1, 0, 2))     # (T, B, E)
    if BP != B:
        x = jnp.pad(x, ((0, 0), (0, BP - B), (0, 0)))
    layer_in = x[None]                                            # (1, T, BP, E)
    lengths_p = jnp.pad(lengths.astype(jnp.int32), (0, BP - B),
                        constant_values=1)                        # (BP,)

    for layer in (0, 1):
        w_ih = params[f"w_ih_l{layer}"].astype(jnp.bfloat16)
        w_hh = params[f"w_hh_l{layer}"].astype(jnp.bfloat16)
        gx = _run_input_proj(layer_in, w_ih, params[f"b_l{layer}"], tc)
        layer_in = _run_bilstm_recurrence(gx, w_hh, tc)           # (2, T, BP, H)
        # dropout(0.2) between layers is identity in eval mode.

    y = _run_gather_head(layer_in, lengths_p, params["w1"], params["b1"],
                         params["w2"], params["b2"])              # (BP, 1)
    return y[:B, 0]                                               # squeeze(-1)


# ---------------------------------------------------------------------------
# Pure-JAX f32 reference (correctness check only)
# ---------------------------------------------------------------------------
def _ref_bilstm_layer(x_stacked, w_ih, w_hh, bias, H):
    S, T, B, F = x_stacked.shape
    gx = jnp.einsum("stbf,sfg->tbg", x_stacked, w_ih) + bias      # (T, B, 8H)

    def run(gx_dir, whh, reverse):
        def step(carry, g_t):
            h, c = carry
            gates = g_t + h @ whh
            i = jax.nn.sigmoid(gates[:, :H])
            f = jax.nn.sigmoid(gates[:, H:2 * H])
            g = jnp.tanh(gates[:, 2 * H:3 * H])
            o = jax.nn.sigmoid(gates[:, 3 * H:])
            c = f * c + i * g
            h = o * jnp.tanh(c)
            return (h, c), h
        init = (jnp.zeros((B, H), jnp.float32), jnp.zeros((B, H), jnp.float32))
        _, hs = lax.scan(step, init, gx_dir, reverse=reverse)
        return hs

    hf = run(gx[..., :4 * H], w_hh[0], False)
    hb = run(gx[..., 4 * H:], w_hh[1], True)
    return jnp.stack([hf, hb])                                    # (2, T, B, H)


def reference_forward(params, antigen, lengths, hidden_dim):
    H = hidden_dim
    h = jnp.transpose(antigen.astype(jnp.float32), (1, 0, 2))[None]
    for layer in (0, 1):
        h = _ref_bilstm_layer(h, params[f"w_ih_l{layer}"],
                              params[f"w_hh_l{layer}"],
                              params[f"b_l{layer}"], H)
    t_idx = (lengths - 1).astype(jnp.int32)
    b_idx = jnp.arange(h.shape[2])
    feat_f = h[0, t_idx, b_idx, :]
    feat_b = h[1, t_idx, b_idx, :]
    h1 = feat_f @ params["w1"][0] + feat_b @ params["w1"][1] + params["b1"]
    y = h1 @ params["w2"] + params["b2"]
    return y[:, 0]


# ---------------------------------------------------------------------------
if __name__ == "__main__":
    B, T, E, H = 2, 8, 8, 32

    key = jax.random.PRNGKey(0)
    k_param, k_x = jax.random.split(key)

    params = init_params(k_param, E, H)

    antigen = jax.random.normal(k_x, (B, T, E), jnp.float32)
    antigen_reversed = antigen[:, ::-1, :]
    antigen_full = antigen
    lengths = jnp.array([T, 5], dtype=jnp.int32)
    mask = (jnp.arange(T)[None, :] < lengths[:, None]).astype(jnp.float32)

    out = custom_lstm2_forward(params, antigen, antigen_reversed, antigen_full,
                               mask, lengths, H, time_chunk=4)
    out = jax.block_until_ready(out)

    ref = jax.block_until_ready(reference_forward(params, antigen, lengths, H))

    assert out.shape == (B,), out.shape
    # Loose tolerance: kernel matmuls use bf16 MXU operands (f32 accumulation),
    # the reference is pure f32.
    assert jnp.allclose(out, ref, atol=3e-2, rtol=3e-2), (out, ref)
    print("KERNEL_OK")
</pallas_src>

<mosaic_0001>
module attributes {stable_mosaic.version = 11 : i64} {
  func.func @_input_proj_kernel(%arg0: i32, %arg1: memref<1x4x8x8xf32, #tpu.memory_space<vmem>>, %arg2: memref<1x8x256xbf16, #tpu.memory_space<vmem>>, %arg3: memref<1x256xf32, #tpu.memory_space<vmem>>, %arg4: memref<2x4x8x128xf32, #tpu.memory_space<vmem>>) attributes {dimension_semantics = [#tpu.dimension_semantics<parallel>], iteration_bounds = array<i64: 2>, scalar_prefetch = 0 : i64, scratch_operands = 0 : i64, tpu.core_type = #tpu.core_type<tc>, window_params = [{transform_indices = @transform_0, window_bounds = array<i64: 1, 4, 8, 8>}, {pipeline_mode = #tpu.pipeline_mode<synchronous>, transform_indices = @transform_1, window_bounds = array<i64: 1, 8, 256>}, {pipeline_mode = #tpu.pipeline_mode<synchronous>, transform_indices = @transform_2, window_bounds = array<i64: 1, 256>}, {transform_indices = @transform_3, window_bounds = array<i64: 2, 4, 8, 128>}]} {
    %cst = arith.constant 0.000000e+00 : f32
    %0 = vector.broadcast %cst : f32 to vector<32x256xf32>
    %c0 = arith.constant 0 : index
    %c0_0 = arith.constant 0 : index
    %c0_1 = arith.constant 0 : index
    %c0_2 = arith.constant 0 : index
    %1 = vector.load %arg1[%c0, %c0_0, %c0_1, %c0_2] : memref<1x4x8x8xf32, #tpu.memory_space<vmem>>, vector<1x4x8x8xf32>
    %2 = vector.shape_cast %1 : vector<1x4x8x8xf32> to vector<4x8x8xf32>
    %3 = vector.shape_cast %2 : vector<4x8x8xf32> to vector<32x8xf32>
    %4 = arith.truncf %3 : vector<32x8xf32> to vector<32x8xbf16>
    %c0_3 = arith.constant 0 : index
    %c0_4 = arith.constant 0 : index
    %c0_5 = arith.constant 0 : index
    %5 = vector.load %arg2[%c0_3, %c0_4, %c0_5] : memref<1x8x256xbf16, #tpu.memory_space<vmem>>, vector<1x8x256xbf16>
    %6 = vector.shape_cast %5 : vector<1x8x256xbf16> to vector<8x256xbf16>
    %cst_6 = arith.constant dense<0.000000e+00> : vector<32x256xf32>
    %7 = tpu.matmul %4, %6, %cst_6 {dimension_numbers = #tpu.dot_dimension_numbers<[1], [0], [0], [1], [0, 0, 1, 1], [], []>} : vector<32x8xbf16>, vector<8x256xbf16>, vector<32x256xf32> -> vector<32x256xf32>
    %8 = arith.addf %0, %7 : vector<32x256xf32>
    %c0_7 = arith.constant 0 : index
    %c0_8 = arith.constant 0 : index
    %9 = vector.load %arg3[%c0_7, %c0_8] : memref<1x256xf32, #tpu.memory_space<vmem>>, vector<1x256xf32>
    %10 = vector.broadcast %9 : vector<1x256xf32> to vector<32x256xf32>
    %11 = arith.addf %8, %10 : vector<32x256xf32>
    %12 = vector.shape_cast %11 : vector<32x256xf32> to vector<4x8x256xf32>
    %13 = vector.extract_strided_slice %12 {offsets = [0, 0, 0], sizes = [4, 8, 128], strides = [1, 1, 1]} : vector<4x8x256xf32> to vector<4x8x128xf32>
    %c0_9 = arith.constant 0 : index
    %c0_10 = arith.constant 0 : index
    %c0_11 = arith.constant 0 : index
    %c0_12 = arith.constant 0 : index
    %14 = vector.load %arg4[%c0_9, %c0_10, %c0_11, %c0_12] : memref<2x4x8x128xf32, #tpu.memory_space<vmem>>, vector<1x4x8x128xf32>
    %15 = vector.shape_cast %14 : vector<1x4x8x128xf32> to vector<4x8x128xf32>
    %16 = vector.shape_cast %13 : vector<4x8x128xf32> to vector<1x4x8x128xf32>
    tpu.vector_store %arg4[%c0_9, %c0_10, %c0_11, %c0_12], %16 {strides = array<i32>} : memref<2x4x8x128xf32, #tpu.memory_space<vmem>>, vector<1x4x8x128xf32>,
    %17 = vector.extract_strided_slice %12 {offsets = [0, 0, 128], sizes = [4, 8, 128], strides = [1, 1, 1]} : vector<4x8x256xf32> to vector<4x8x128xf32>
    %c1 = arith.constant 1 : index
    %c0_13 = arith.constant 0 : index
    %c0_14 = arith.constant 0 : index
    %c0_15 = arith.constant 0 : index
    %18 = vector.load %arg4[%c1, %c0_13, %c0_14, %c0_15] : memref<2x4x8x128xf32, #tpu.memory_space<vmem>>, vector<1x4x8x128xf32>
    %19 = vector.shape_cast %18 : vector<1x4x8x128xf32> to vector<4x8x128xf32>
    %20 = vector.shape_cast %17 : vector<4x8x128xf32> to vector<1x4x8x128xf32>
    tpu.vector_store %arg4[%c1, %c0_13, %c0_14, %c0_15], %20 {strides = array<i32>} : memref<2x4x8x128xf32, #tpu.memory_space<vmem>>, vector<1x4x8x128xf32>,
    return
  }
  func.func @transform_0(%arg0: i32) -> (i32, i32, i32, i32) {
    %c0_i32 = arith.constant 0 : i32
    %c0_i32_0 = arith.constant 0 : i32
    %c0_i32_1 = arith.constant 0 : i32
    %c0_i32_2 = arith.constant 0 : i32
    return %c0_i32, %arg0, %c0_i32_0, %c0_i32_1 : i32, i32, i32, i32
  }
  func.func @transform_1(%arg0: i32) -> (i32, i32, i32) {
    %c0_i32 = arith.constant 0 : i32
    %c0_i32_0 = arith.constant 0 : i32
    %c0_i32_1 = arith.constant 0 : i32
    %c0_i32_2 = arith.constant 0 : i32
    return %c0_i32, %c0_i32_0, %c0_i32_1 : i32, i32, i32
  }
  func.func @transform_2(%arg0: i32) -> (i32, i32) {
    %c0_i32 = arith.constant 0 : i32
    %c0_i32_0 = arith.constant 0 : i32
    %c0_i32_1 = arith.constant 0 : i32
    return %c0_i32, %c0_i32_0 : i32, i32
  }
  func.func @transform_3(%arg0: i32) -> (i32, i32, i32, i32) {
    %c0_i32 = arith.constant 0 : i32
    %c0_i32_0 = arith.constant 0 : i32
    %c0_i32_1 = arith.constant 0 : i32
    %c0_i32_2 = arith.constant 0 : i32
    return %c0_i32, %arg0, %c0_i32_0, %c0_i32_1 : i32, i32, i32, i32
  }
}

</mosaic_0001>

<bundles_post_ra>
// kernel: tpu_custom_call.1
= control target key start
LH: loop header
LB: loop body
LE: loop exit
PB: predicated region body
PF: predicated region fallthrough
CT: control target
= control target key end

     0   :  { %8 = vsyncpa [#allocation3], 0  ;;  %s832_s0 = inlined_call_operand.hbm [shape: f32[1,8,8,8], index: 0, kind: input, shape index: {}]   ;;  %s833_s1 = inlined_call_operand.hbm [shape: bf16[1,8,256], index: 1, kind: input, shape index: {}]   ;;  %s834_s2 = inlined_call_operand.vmem [shape: f32[1,256], index: 2, kind: input, shape index: {}]   ;;  %s835_s3 = inlined_call_operand.hbm [shape: f32[2,8,8,128], index: 3, kind: output, shape index: {}]  }
   0x1   :  { %10 = vsyncpa [#allocation3 + $0x1], 0 }
   0x2   :  { %11 = vsyncpa [#allocation6], 0 }
   0x3   :  { %12 = vsyncpa [#allocation4], 0 }
   0x4   :  { %14 = vsyncpa [#allocation4 + $0x1], 0  ;;  %s659_s12 = smov 0   ;;  %s661_s13 = smov 0  }
   0x5   :  { %s663_s14 = smov 0   ;;  %s665_s15 = smov 0  }
   0x6 LB: > { %s680_s16 = sadd.s32 4294967295, %s625_s15   ;;  %s425_s17 = sadd.s32 4294967294, %s625_s15   ;;  %s625_s15 = sphi %s665_s15, %s858_s15   ;;  %s621_s14 = sphi %s663_s14, %s857_s14   ;;  %s617_s13 = sphi %s661_s13, %s856_s13   ;;  %s613_s12 = sphi %s659_s12, %s855_s12  }
   0x7   : > { %s684_s18 = sadd.s32 1, %s625_s15   ;;  %s27_s19 = sadd.s32 1, %s621_s14 }
   0x8   : > { %s24_s20 = ssub.s32 %s625_s15, %s684_s18  ;;  %p34_p0 = scmp.ne.s32.totalorder %s621_s14, %s617_s13 }
   0x9   : > { %p25_p1 = scmp.eq.s32.totalorder %s24_s20, 0  ;;  %p35_p2 = scmp.eq.s32.totalorder %s625_s15, 0 }
   0xa   : > { %p40_p3 = scmp.ne.s32.totalorder %s617_s13, %s613_s12  ;;  %p836_p4 = scmp.eq.s32.totalorder %s680_s16, 0 }
   0xb   : > { %s696_s21 = scalar_select %p25_p1, %s621_s14, %s27_s19  }
   0xc   : > { %p698_p5 = por %p35_p2, %p34_p0  ;;  %p704_p6 = por %p836_p4, %p40_p3 }
   0xd   : > { %p106_p7 = scmp.eq.s32.totalorder %s680_s16, 1  ;;  %p112_p8 = scmp.eq.s32.totalorder %s425_s17, 1 }
   0xe   : > { %s841_s23 = scalar_select %p704_p6, 1, 0 }
   0xf   : > { %p426_p9 = scmp.ge.s32.totalorder %s625_s15, 1  ;;  %p119_p10 = scmp.lt.s32.totalorder %s625_s15, 3 }
  0x10   : > { %p711_p11 = por %p106_p7, %p34_p0  ;;  %p715_p12 = por %p112_p8, %p40_p3 }
  0x11   : > { %p719_p13 = pnand %p426_p9, %p119_p10  ;;  %s627_s27 = smov [#allocation5]  }
  0x12   : > { %s842_s24 = scalar_select %p711_p11, 1, 0 }
  0x13   : > { %s843_s25 = scalar_select %p715_p12, 1, 0 }
  0x14   : > { %s844_s26 = scalar_select %p719_p13, 1, 0 }
  0x15   : > { %p468_p2 = pneg %p719_p13  ;;  %s132_s28 = sshll.u32 %s627_s27, 4  ;;  %s133_s28 = int_to_ptr.vmem [resolvable:$true] %s132_s28 }
  0x16   : > { %p481_p4 = scmp.lt.s32.totalorder %s625_s15, 2  ;;  %p845_p0 = scmp.eq.s32.totalorder %s680_s16, 0 }
  0x17   : > { %s146_s30 = sand.u32 1, %s621_s14   ;;  %s540_s6 = scalar_lea.vmem %s133_s28, 128 }
  0x18   : > { %p729_p7 = pnand %p468_p2, %p845_p0  ;;  %p736_p3 = pnand %p481_p4, %p698_p5 }
  0x19   : > { %s429_s5 = sshll.u32 %s146_s30, 5  ;;  %p541_p9 = scmp.ne.s32.totalorder %s133_s28, %s540_s6 }
  0x1a   : > { %p531_p8 = pneg %p729_p7  ;;  %p548_p12 = scmp.lt.s32.totalorder %s133_s28, %s133_s28 }
  0x1b   : > { %p549_p11 = scmp.lt.s32.totalorder %s540_s6, %s540_s6 }
  0x1c   : > { %p543_p10 = pnand %p541_p9, %p531_p8 }
  0x1d   : > { %p550_p2 = por %p549_p11, %p548_p12 }
  0x1e   : > { %p544_p1 = pneg %p543_p10 }
  0x20   : > { %p551_p0 = pnand %p550_p2, %p544_p1 }
  0x22   : > { %554 = shalt.err (!%p551_p0)
}
  0x23   : > { %471 = dma.hbm_to_vmem [thread:$0]  (!%p729_p7), %s833_s1, 128, %s133_s28, [#allocation6]  }
  0x24   : > { %s450_s9 = sshll.u32 %s625_s15, 9  ;;  %s150_s10 = scalar_lea.vmem [#allocation2], %s429_s5 }
  0x25   : > { %s157_s11 = sshll.u32 %s150_s10, 4  ;;  %s751_s20 = scalar_lea.hbm %s832_s0, %s450_s9  ;;  %s753_s11 = int_to_ptr.vmem [resolvable:$true] %s157_s11 }
  0x26   : > { %s755_s22 = scalar_lea.sflag [#allocation3], %s146_s30  ;;  %s555_s27 = scalar_lea.hbm %s751_s20, 512 }
  0x27   : > { %p556_p4 = scmp.ne.s32.totalorder %s751_s20, %s555_s27  ;;  %p557_p5 = pneg %p736_p3 }
  0x28   : > { %s560_s5 = scalar_lea.hbm %s832_s0, 1024  ;;  %p561_p1 = scmp.lt.s32.totalorder %s751_s20, %s832_s0 }
  0x29   : > { %p558_p11 = pnand %p557_p5, %p556_p4  ;;  %p562_p7 = scmp.lt.s32.totalorder %s560_s5, %s555_s27 }
  0x2b   : > { %p559_p12 = pneg %p558_p11  ;;  %p563_p8 = por %p562_p7, %p561_p1 }
  0x2d   : > { %p564_p9 = pnand %p563_p8, %p559_p12 }
  0x2f   : > { %567 = shalt.err (!%p564_p9)
}
  0x30   : > { %s568_s30 = scalar_lea.vmem %s753_s11, 512  ;;  %s628_s8 = smov [#allocation2]  }
  0x31   : > { %p569_p10 = scmp.ne.s32.totalorder %s753_s11, %s568_s30  ;;  %s573_s9 = sshll.u32 %s628_s8, 4  ;;  %s574_s9 = int_to_ptr.vmem [resolvable:$false] %s573_s9 }
  0x32   : > { %s575_s10 = scalar_lea.vmem %s574_s9, 1024  ;;  %p576_p4 = scmp.lt.s32.totalorder %s753_s11, %s574_s9 }
  0x33   : > { %p571_p2 = pnand %p569_p10, %p557_p5  ;;  %p577_p11 = scmp.lt.s32.totalorder %s575_s10, %s568_s30 }
  0x35   : > { %p572_p0 = pneg %p571_p2  ;;  %p578_p6 = por %p577_p11, %p576_p4 }
  0x37   : > { %p579_p13 = pnand %p578_p6, %p572_p0 }
  0x39   : > { %582 = shalt.err (!%p579_p13)
}
  0x3a   : > { %s629_s17 = smov 128   ;;  %s630_s19 = smov 8  }
  0x3b   : > { %475 = dma.hbm_to_vmem [thread:$0]  (!%p736_p3), %s751_s20, 512, %s753_s11, %s755_s22, %s629_s17, %s629_s17, %s630_s19  }
  0x3c   : > { %p848_p5 = scmp.ne.s32.totalorder %s844_s26, 0 }
  0x3d   : > { %s779_s27 = sand.u32 (!%p848_p5), 1, %s617_s13   ;;  %p849_p6 = scmp.ne.s32.totalorder (!%p848_p5), %s841_s23, 0 }
  0x3e   : > { %169 = sbr.rel (%p848_p5) target bundleno = 291 (0x123), region = 32  ;;  %s433_s28 = sshll.u32 (!%p848_p5), %s779_s27, 5 }
  0x3f   : > { %s172_s29 = scalar_lea.sflag (!%p848_p5), [#allocation3], %s779_s27  ;;  %s175_s5 = scalar_lea.vmem (!%p848_p5), [#allocation2], %s433_s28 }
  0x43   : > { %600 = dma.done.wait (%p849_p6), %s172_s29, 512  }
  0x44   : > { %602 = vsyncadd (%p849_p6), %s172_s29, 4294966784  ;;  %p850_p13 = scmp.eq.s32.totalorder %s680_s16, 0 }
  0x46   : > { %604 = dma.done.wait (%p850_p13), [#allocation6], 128   ;;  %p851_p3 = pmov %p850_p13 }
  0x47   : > { %v631_v0 = vmov 0   ;;  %v211_v1 = vld [vmem:[#allocation5] sm:$0xff]  ;;  %vm236_vm0 = vcmask 1043456   ;;  %v206_v3 = vld [vmem:[%s175_s5 + $0x8] sm:$0xff]  ;;  %v207_v6 = vld [vmem:[%s175_s5 + $0x10] sm:$0xff]  ;;  %vm229_vm1 = vcmask 64512   ;;  %v214_v11 = vlaneseq }
  0x48   : > { %606 = vsyncadd (%p851_p3), [#allocation6], 4294967168  ;;  %275 = vmatprep.mubr.bf16.mxu0 %v631_v0  ;;  %285 = vmatprep.mubr.bf16.mxu1 %v631_v0  ;;  %v205_v2 = vld [vmem:[%s175_s5] sm:$0xff]  ;;  %v437_v4 = vcombine.high %v211_v1, %v211_v1  ;;  %v436_v5 = vcombine.low %v211_v1, %v211_v1  ;;  %v208_v7 = vld [vmem:[%s175_s5 + $0x18] sm:$0xff]  ;;  %s435_s4 = sshll.u32 %s779_s27, 6  ;;  %s306_s20 = scalar_lea.sflag [#allocation4], %s779_s27 }
  0x49   : > { %v209_v9 = vpack.c.bf16 %v206_v3, %v205_v2  ;;  %v210_v10 = vpack.c.bf16 %v208_v7, %v207_v6  ;;  %v215_v12 = vshrl.u32 %v214_v11, 7  ;;  %v212_v14 = vld [vmem:[%s834_s2] sm:$0x3]  ;;  %s201_s11 = scalar_lea.vmem [#allocation7], %s435_s4 }
  0x4a   : > { %438 = vmatprep.subr.msk.bf16.mxu0 %vm236_vm0, %v437_v4  ;;  %452 = vmatprep.subr.msk.bf16.mxu1 %vm236_vm0, %v437_v4  ;;  %v238_v8 = vsel %vm236_vm0, %v436_v5, 0 }
  0x4b   : > { %258 = vmatpush1.bf16.msra.mxu0 %v238_v8  ;;  %453 = vmatpush1.bf16.msra.mxu1 %v238_v8  ;;  %v216_v13 = vsub.s32 0, %v215_v12  ;;  %v220_v15 = vsub.s32 1, %v215_v12 }
  0x4d   : > { %v217_v16 = vrot.slane %v212_v14, %v216_v13  ;;  %v221_v17 = vrot.slane %v212_v14, %v220_v15 }
  0x4e   : > { %439 = vmatmul.mubr.msk.bf16.vlgmr.msra.gmra.mxu0 %vm229_vm1, %v209_v9  ;;  %440 = vmatmul.mubr.msk.bf16.vlgmr.msra.gmra.mxu1 %vm229_vm1, %v210_v10 }
 0x10e   : > { %v277_v18 = vpop.f32.mrf.mxu0  ;;  %v287_v19 = vpop.f32.mrf.mxu1 }
 0x10f   : > { %v278_v20 = vadd.f32 %v277_v18, %v217_v16  ;;  %v288_v21 = vadd.f32 %v287_v19, %v217_v16 }
 0x110   : > { %v279_v22 = vpop.f32.mrf.mxu0  ;;  %v289_v23 = vpop.f32.mrf.mxu1 }
 0x111   : > { %296 = vst [vmem:[%s201_s11] sm:$0xff] %v278_v20  ;;  %298 = vst [vmem:[%s201_s11 + $0x10] sm:$0xff] %v288_v21  ;;  %v280_v24 = vadd.f32 %v279_v22, %v221_v17  ;;  %v290_v25 = vadd.f32 %v289_v23, %v221_v17 }
 0x112   : > { %v281_v26 = vpop.f32.mrf.mxu0  ;;  %v291_v27 = vpop.f32.mrf.mxu1 }
 0x113   : > { %441 = vst [vmem:[%s201_s11 + $0x20] sm:$0xff] %v280_v24  ;;  %443 = vst [vmem:[%s201_s11 + $0x30] sm:$0xff] %v290_v25  ;;  %v282_v28 = vadd.f32 %v281_v26, %v217_v16  ;;  %v292_v29 = vadd.f32 %v291_v27, %v217_v16 }
 0x114   : > { %v283_v30 = vpop.f32.mrf.mxu0  ;;  %v293_v31 = vpop.f32.mrf.mxu1 }
 0x115   : > { %297 = vst [vmem:[%s201_s11 + $0x8] sm:$0xff] %v282_v28  ;;  %299 = vst [vmem:[%s201_s11 + $0x18] sm:$0xff] %v292_v29  ;;  %v284_v32 = vadd.f32 %v283_v30, %v221_v17  ;;  %v294_v33 = vadd.f32 %v293_v31, %v221_v17 }
 0x117   : > { %442 = vst [vmem:[%s201_s11 + $0x28] sm:$0xff] %v284_v32  ;;  %444 = vst [vmem:[%s201_s11 + $0x38] sm:$0xff] %v294_v33 }
 0x118   : > { %s451_s22 = sshll.u32 %s680_s16, 9  ;;  %s329_s6 = sshll.u32 %s201_s11, 4  ;;  %s330_s6 = int_to_ptr.vmem [resolvable:$true] %s329_s6 }
 0x119   : > { %s318_s8 = scalar_lea.hbm %s835_s3, %s451_s22  ;;  %s632_s9 = smov 512  }
 0x11a   : > { %p852_p12 = scmp.ne.s32.totalorder %s842_s24, 0  ;;  %s633_s10 = smov 1024  }
 0x11b   : > { %s634_s17 = smov 4   ;;  %s635_s19 = smov 128  }
 0x11c   : > { %460 = sst [smem:[#allocation9]] (%p852_p12), %s632_s9  ;;  %s636_s16 = smov 8  }
 0x11d   : > { %461 = sst [smem:[#allocation9 + $0x1]] (%p852_p12), %s633_s10  ;;  %s637_s27 = smov 131072  }
 0x11e   : > { %462 = sst [smem:[#allocation9 + $0x2]] (%p852_p12), %s634_s17  ;;  %s638_s28 = smov 0  }
 0x11f   : > { %463 = sst [smem:[#allocation9 + $0x3]] (%p852_p12), %s635_s19 }
 0x120   : > { %464 = sst [smem:[#allocation9 + $0x4]] (%p852_p12), %s635_s19 }
 0x121   : > { %465 = sst [smem:[#allocation9 + $0x5]] (%p852_p12), %s636_s16 }
 0x122   : > { %466 = dma.general (%p852_p12), %s330_s6, 1024, %s318_s8, %s306_s20, %s637_s27, [#allocation9], %s638_s28, 0  }
 0x123 PF: > { %s357_s29 = sand.u32 1, %s613_s12   ;;  %p853_p1 = scmp.ne.s32.totalorder %s843_s25, 0 }
 0x124   : > { %p854_p7 = scmp.ge.s32.totalorder %s625_s15, 2  ;;  %s358_s5 = scalar_lea.sflag [#allocation4], %s357_s29 }
 0x126   : > { %p477_p8 = pnand %p854_p7, %p853_p1 }
 0x128   : > { %p478_p9 = pneg %p477_p8 }
 0x12a   : > { %608 = dma.done.wait (%p478_p9), %s358_s5, 1024  }
 0x12b   : > { %610 = vsyncadd (%p478_p9), %s358_s5, 4294966272  ;;  %p17_p10 = scmp.ge.s32.totalorder %s684_s18, 4   ;;  %s855_s12 = smov %s617_s13 }
 0x12c   : > { %s856_s13 = smov %s621_s14  ;;  %s857_s14 = smov %s696_s21 }
 0x12d   : > { %s858_s15 = smov %s684_s18  ;;  %19 = sbr.rel (!%p17_p10) target bundleno = 6 (0x6), region = 87 }
 0x132   :  { %363 = vsyncpa [#allocation3], 1 }
 0x133   :  { %365 = vsyncpa [#allocation3 + $0x1], 1 }
 0x134   :  { %366 = vsyncpa [#allocation6], 1 }
 0x135   :  { %367 = vsyncpa [#allocation4], 1 }
 0x136   :  { %369 = vsyncpa [#allocation4 + $0x1], 1 }

</bundles_post_ra>
